<compile_context>
chip_gen: v7x
topology: tpu7x:2x2x1
jax: 0.10.0
libtpu: 0.0.40
codegen_flags: <defaults>
</compile_context>

<pallas_src>
import functools

import jax
import jax.numpy as jnp
from jax.experimental import pallas as pl
from jax.experimental.pallas import tpu as pltpu


def _round_up(x, m):
    return (x + m - 1) // m * m


def _choose_tile(s_pad, target=512):
    """Largest multiple of 8 that divides s_pad and is <= target."""
    ts = min(s_pad, _round_up(target, 8))
    ts -= ts % 8
    ts = max(ts, 8)
    while s_pad % ts:
        ts -= 8
    return ts


def _bert_embeddings_kernel(words_ref, tt_ref, pos_ref, type_ref, g_ref, b_ref,
                            o_ref, *, eps, type_vocab):
    # Gathered word rows (1, TS, H) + contiguous position slab (TS, H).
    x = words_ref[...].astype(jnp.float32) + pos_ref[...].astype(jnp.float32)

    # Token-type embedding: tiny table resident in VMEM; select rows with
    # vectorized masks (no gather, no extra HBM traffic).
    tt = tt_ref[...]                                  # (1, TS, 1) int32
    tbl = type_ref[...].astype(jnp.float32)           # (type_vocab, H)
    t_emb = jnp.zeros_like(x)
    for v in range(type_vocab):                       # static, tiny unroll
        t_emb = jnp.where(tt == v, tbl[v], t_emb)
    x = x + t_emb

    # LayerNorm over H (eps inside the sqrt, matching BertLayerNorm).
    mean = jnp.mean(x, axis=-1, keepdims=True)
    var = jnp.mean(jnp.square(x - mean), axis=-1, keepdims=True)
    xhat = (x - mean) * jax.lax.rsqrt(var + eps)
    y = g_ref[...].astype(jnp.float32) * xhat + b_ref[...].astype(jnp.float32)

    # TODO(synk): dropout omitted (identity / eval mode); training-mode dropout
    # would use pltpu.prng_seed + pltpu.prng_random_bits.
    o_ref[...] = y.astype(o_ref.dtype)


def bert_embeddings(input_ids, token_type_ids=None, *, word_table, pos_table,
                    type_table, gamma, beta, eps=1e-12, seq_tile=512,
                    out_dtype=None):
    B, S = input_ids.shape
    _, H = word_table.shape
    T = type_table.shape[0]
    out_dtype = out_dtype or word_table.dtype

    # --- wrapper-side prep ---------------------------------------------------
    ids = input_ids.astype(jnp.int32)
    if token_type_ids is None:
        tt = jnp.zeros((B, S), jnp.int32)
    else:
        tt = token_type_ids.astype(jnp.int32)

    # Pad S to a multiple of the token tile so every block is full (unmasked
    # vector stores); padded rows are sliced off at the end.
    S_pad = _round_up(S, 8)
    TS = _choose_tile(S_pad, target=seq_tile)
    n_seq_tiles = S_pad // TS

    if S_pad != S:
        pad = ((0, 0), (0, S_pad - S))
        ids = jnp.pad(ids, pad)
        tt = jnp.pad(tt, pad)

    # Word-embedding gather: the (vocab, H) table cannot live in VMEM, so the
    # data-dependent row gather uses XLA's native take (near HBM roofline);
    # the Pallas kernel fuses everything downstream of it.
    # Caller contract: ids / token-type ids must be in range for their tables.
    words = jnp.take(word_table, ids, axis=0)            # (B, S_pad, H)

    # Position rows actually used (arange(S) per sequence), padded so each
    # sequence tile maps to one contiguous (TS, H) slab.
    pos = pos_table[:S]
    if S_pad != S:
        pos = jnp.pad(pos, ((0, S_pad - S), (0, 0)))

    tt3 = tt.reshape(B, S_pad, 1)
    gamma2 = gamma.reshape(1, H)
    beta2 = beta.reshape(1, H)

    # --- pallas_call ---------------------------------------------------------
    # Grid: sequence-tile axis OUTER, batch INNER -> the pos slab / type table /
    # gamma / beta block indices are constant across the inner loop, so Pallas
    # fetches them only when they actually change.
    grid = (n_seq_tiles, B)

    in_specs = [
        pl.BlockSpec((1, TS, H), lambda s, b: (b, s, 0)),   # gathered word rows
        pl.BlockSpec((1, TS, 1), lambda s, b: (b, s, 0)),   # token-type ids
        pl.BlockSpec((TS, H), lambda s, b: (s, 0)),         # position slab
        pl.BlockSpec((T, H), lambda s, b: (0, 0)),          # type table (resident)
        pl.BlockSpec((1, H), lambda s, b: (0, 0)),          # gamma
        pl.BlockSpec((1, H), lambda s, b: (0, 0)),          # beta
    ]
    out_specs = pl.BlockSpec((1, TS, H), lambda s, b: (b, s, 0))

    # Scoped-VMEM budget: double-buffered words/pos/tt/out tiles + resident
    # small tables, with ~2x headroom (kept well below v7x's 64 MiB physical).
    in_bytes = TS * H * (jnp.dtype(words.dtype).itemsize
                         + jnp.dtype(pos.dtype).itemsize) + TS * 4
    out_bytes = TS * H * jnp.dtype(out_dtype).itemsize
    resident = (T + 2) * H * 4
    vmem_limit = 2 * 2 * (in_bytes + out_bytes) + 2 * resident
    vmem_limit = int(min(max(vmem_limit, 16 * 1024 * 1024), 48 * 1024 * 1024))

    out = pl.pallas_call(
        functools.partial(_bert_embeddings_kernel, eps=eps, type_vocab=T),
        out_shape=jax.ShapeDtypeStruct((B, S_pad, H), out_dtype),
        grid_spec=pltpu.PrefetchScalarGridSpec(
            num_scalar_prefetch=0,
            grid=grid,
            in_specs=in_specs,
            out_specs=out_specs,
        ),
        compiler_params=pltpu.CompilerParams(
            dimension_semantics=("parallel", "parallel"),
            vmem_limit_bytes=vmem_limit,
        ),
    )(words, tt3, pos, type_table, gamma2, beta2)

    if S_pad != S:
        out = out[:, :S, :]
    return out


def bert_embeddings_ref(input_ids, token_type_ids, word_table, pos_table,
                        type_table, gamma, beta, *, eps=1e-12):
    B, S = input_ids.shape
    pos_ids = jnp.broadcast_to(jnp.arange(S, dtype=jnp.int32), (B, S))
    e = (word_table[input_ids]
         + pos_table[pos_ids]
         + type_table[token_type_ids])
    mean = e.mean(-1, keepdims=True)
    var = jnp.square(e - mean).mean(-1, keepdims=True)
    xhat = (e - mean) / jnp.sqrt(var + eps)
    return gamma[None, None, :] * xhat + beta[None, None, :]


if __name__ == "__main__":
    # Small, BERT-shaped config: vocab=64, max_pos=16, type_vocab=2, hidden=128
    B, S, H = 2, 8, 128
    VOCAB, MAX_POS, TYPE_VOCAB = 64, 16, 2

    key = jax.random.PRNGKey(0)
    k_ids, k_tt, k_w, k_p, k_t, k_g, k_b = jax.random.split(key, 7)

    input_ids = jax.random.randint(k_ids, (B, S), 0, VOCAB, dtype=jnp.int32)
    token_type_ids = jax.random.randint(k_tt, (B, S), 0, TYPE_VOCAB,
                                        dtype=jnp.int32)

    word_table = 0.02 * jax.random.normal(k_w, (VOCAB, H), jnp.float32)
    pos_table = 0.02 * jax.random.normal(k_p, (MAX_POS, H), jnp.float32)
    type_table = 0.02 * jax.random.normal(k_t, (TYPE_VOCAB, H), jnp.float32)
    gamma = 1.0 + 0.1 * jax.random.normal(k_g, (H,), jnp.float32)
    beta = 0.1 * jax.random.normal(k_b, (H,), jnp.float32)

    out = bert_embeddings(input_ids, token_type_ids,
                          word_table=word_table, pos_table=pos_table,
                          type_table=type_table, gamma=gamma, beta=beta)
    out = jax.block_until_ready(out)

    ref = bert_embeddings_ref(input_ids, token_type_ids, word_table, pos_table,
                              type_table, gamma, beta)
    assert out.shape == (B, S, H)
    assert jnp.allclose(out, ref, rtol=1e-5, atol=1e-5), (
        f"max abs err = {jnp.max(jnp.abs(out - ref))}")

    print("KERNEL_OK")
</pallas_src>

<mosaic_0001>
module attributes {stable_mosaic.version = 11 : i64} {
  func.func @_bert_embeddings_kernel(%arg0: i32, %arg1: i32, %arg2: memref<1x8x128xf32, #tpu.memory_space<vmem>>, %arg3: memref<1x8x1xi32, #tpu.memory_space<vmem>>, %arg4: memref<8x128xf32, #tpu.memory_space<vmem>>, %arg5: memref<2x128xf32, #tpu.memory_space<vmem>>, %arg6: memref<1x128xf32, #tpu.memory_space<vmem>>, %arg7: memref<1x128xf32, #tpu.memory_space<vmem>>, %arg8: memref<1x8x128xf32, #tpu.memory_space<vmem>>) attributes {dimension_semantics = [#tpu.dimension_semantics<parallel>, #tpu.dimension_semantics<parallel>], iteration_bounds = array<i64: 1, 2>, scalar_prefetch = 0 : i64, scratch_operands = 0 : i64, tpu.core_type = #tpu.core_type<tc>, window_params = [{transform_indices = @transform_0, window_bounds = array<i64: 1, 8, 128>}, {transform_indices = @transform_1, window_bounds = array<i64: 1, 8, 1>}, {transform_indices = @transform_2, window_bounds = array<i64: 8, 128>}, {pipeline_mode = #tpu.pipeline_mode<synchronous>, transform_indices = @transform_3, window_bounds = array<i64: 2, 128>}, {pipeline_mode = #tpu.pipeline_mode<synchronous>, transform_indices = @transform_4, window_bounds = array<i64: 1, 128>}, {pipeline_mode = #tpu.pipeline_mode<synchronous>, transform_indices = @transform_5, window_bounds = array<i64: 1, 128>}, {transform_indices = @transform_6, window_bounds = array<i64: 1, 8, 128>}]} {
    %c0 = arith.constant 0 : index
    %c0_0 = arith.constant 0 : index
    %c0_1 = arith.constant 0 : index
    %0 = vector.load %arg2[%c0, %c0_0, %c0_1] : memref<1x8x128xf32, #tpu.memory_space<vmem>>, vector<1x8x128xf32>
    %c0_2 = arith.constant 0 : index
    %c0_3 = arith.constant 0 : index
    %1 = vector.load %arg4[%c0_2, %c0_3] : memref<8x128xf32, #tpu.memory_space<vmem>>, vector<8x128xf32>
    %2 = vector.shape_cast %1 : vector<8x128xf32> to vector<1x8x128xf32>
    %3 = arith.addf %0, %2 : vector<1x8x128xf32>
    %c0_4 = arith.constant 0 : index
    %c0_5 = arith.constant 0 : index
    %c0_6 = arith.constant 0 : index
    %4 = vector.load %arg3[%c0_4, %c0_5, %c0_6] : memref<1x8x1xi32, #tpu.memory_space<vmem>>, vector<1x8x1xi32>
    %c0_7 = arith.constant 0 : index
    %c0_8 = arith.constant 0 : index
    %5 = vector.load %arg5[%c0_7, %c0_8] : memref<2x128xf32, #tpu.memory_space<vmem>>, vector<2x128xf32>
    %cst = arith.constant 0.000000e+00 : f32
    %6 = vector.broadcast %cst : f32 to vector<1x8x128xf32>
    %c0_i32 = arith.constant 0 : i32
    %7 = vector.broadcast %c0_i32 : i32 to vector<1x8x1xi32>
    %8 = arith.cmpi eq, %4, %7 : vector<1x8x1xi32>
    %9 = vector.extract_strided_slice %5 {offsets = [0, 0], sizes = [1, 128], strides = [1, 1]} : vector<2x128xf32> to vector<1x128xf32>
    %10 = vector.shape_cast %9 : vector<1x128xf32> to vector<128xf32>
    %11 = vector.shape_cast %8 : vector<1x8x1xi1> to vector<1x8x1xi1>
    %12 = vector.broadcast %11 : vector<1x8x1xi1> to vector<1x8x128xi1>
    %13 = vector.shape_cast %10 : vector<128xf32> to vector<1x1x128xf32>
    %14 = vector.broadcast %13 : vector<1x1x128xf32> to vector<1x8x128xf32>
    %15 = arith.select %12, %14, %6 : vector<1x8x128xi1>, vector<1x8x128xf32>
    %c1_i32 = arith.constant 1 : i32
    %16 = vector.broadcast %c1_i32 : i32 to vector<1x8x1xi32>
    %17 = arith.cmpi eq, %4, %16 : vector<1x8x1xi32>
    %18 = vector.extract_strided_slice %5 {offsets = [1, 0], sizes = [1, 128], strides = [1, 1]} : vector<2x128xf32> to vector<1x128xf32>
    %19 = vector.shape_cast %18 : vector<1x128xf32> to vector<128xf32>
    %20 = vector.shape_cast %17 : vector<1x8x1xi1> to vector<1x8x1xi1>
    %21 = vector.broadcast %20 : vector<1x8x1xi1> to vector<1x8x128xi1>
    %22 = vector.shape_cast %19 : vector<128xf32> to vector<1x1x128xf32>
    %23 = vector.broadcast %22 : vector<1x1x128xf32> to vector<1x8x128xf32>
    %24 = arith.select %21, %23, %15 : vector<1x8x128xi1>, vector<1x8x128xf32>
    %25 = arith.addf %3, %24 : vector<1x8x128xf32>
    %cst_9 = arith.constant dense<0.000000e+00> : vector<1x8xf32>
    %26 = vector.multi_reduction <add>, %25, %cst_9 [2] : vector<1x8x128xf32> to vector<1x8xf32>
    %27 = vector.shape_cast %26 : vector<1x8xf32> to vector<1x8x1xf32>
    %cst_10 = arith.constant 1.280000e+02 : f32
    %28 = vector.broadcast %cst_10 : f32 to vector<1x8x1xf32>
    %29 = arith.divf %27, %28 : vector<1x8x1xf32>
    %30 = vector.broadcast %29 : vector<1x8x1xf32> to vector<1x8x128xf32>
    %31 = arith.subf %25, %30 : vector<1x8x128xf32>
    %32 = arith.mulf %31, %31 : vector<1x8x128xf32>
    %cst_11 = arith.constant dense<0.000000e+00> : vector<1x8xf32>
    %33 = vector.multi_reduction <add>, %32, %cst_11 [2] : vector<1x8x128xf32> to vector<1x8xf32>
    %34 = vector.shape_cast %33 : vector<1x8xf32> to vector<1x8x1xf32>
    %cst_12 = arith.constant 1.280000e+02 : f32
    %35 = vector.broadcast %cst_12 : f32 to vector<1x8x1xf32>
    %36 = arith.divf %34, %35 : vector<1x8x1xf32>
    %37 = vector.broadcast %29 : vector<1x8x1xf32> to vector<1x8x128xf32>
    %38 = arith.subf %25, %37 : vector<1x8x128xf32>
    %cst_13 = arith.constant 9.99999996E-13 : f32
    %39 = vector.broadcast %cst_13 : f32 to vector<1x8x1xf32>
    %40 = arith.addf %36, %39 : vector<1x8x1xf32>
    %41 = math.rsqrt %40 : vector<1x8x1xf32>
    %42 = vector.broadcast %41 : vector<1x8x1xf32> to vector<1x8x128xf32>
    %43 = arith.mulf %38, %42 : vector<1x8x128xf32>
    %c0_14 = arith.constant 0 : index
    %c0_15 = arith.constant 0 : index
    %44 = vector.load %arg6[%c0_14, %c0_15] : memref<1x128xf32, #tpu.memory_space<vmem>>, vector<1x128xf32>
    %45 = vector.shape_cast %44 : vector<1x128xf32> to vector<1x1x128xf32>
    %46 = vector.broadcast %45 : vector<1x1x128xf32> to vector<1x8x128xf32>
    %47 = arith.mulf %46, %43 : vector<1x8x128xf32>
    %c0_16 = arith.constant 0 : index
    %c0_17 = arith.constant 0 : index
    %48 = vector.load %arg7[%c0_16, %c0_17] : memref<1x128xf32, #tpu.memory_space<vmem>>, vector<1x128xf32>
    %49 = vector.shape_cast %48 : vector<1x128xf32> to vector<1x1x128xf32>
    %50 = vector.broadcast %49 : vector<1x1x128xf32> to vector<1x8x128xf32>
    %51 = arith.addf %47, %50 : vector<1x8x128xf32>
    %c0_18 = arith.constant 0 : index
    %c0_19 = arith.constant 0 : index
    %c0_20 = arith.constant 0 : index
    %52 = vector.load %arg8[%c0_18, %c0_19, %c0_20] : memref<1x8x128xf32, #tpu.memory_space<vmem>>, vector<1x8x128xf32>
    tpu.vector_store %arg8[%c0_18, %c0_19, %c0_20], %51 {strides = array<i32>} : memref<1x8x128xf32, #tpu.memory_space<vmem>>, vector<1x8x128xf32>,
    return
  }
  func.func @transform_0(%arg0: i32, %arg1: i32) -> (i32, i32, i32) {
    %c0_i32 = arith.constant 0 : i32
    %c0_i32_0 = arith.constant 0 : i32
    return %arg1, %arg0, %c0_i32 : i32, i32, i32
  }
  func.func @transform_1(%arg0: i32, %arg1: i32) -> (i32, i32, i32) {
    %c0_i32 = arith.constant 0 : i32
    %c0_i32_0 = arith.constant 0 : i32
    return %arg1, %arg0, %c0_i32 : i32, i32, i32
  }
  func.func @transform_2(%arg0: i32, %arg1: i32) -> (i32, i32) {
    %c0_i32 = arith.constant 0 : i32
    %c0_i32_0 = arith.constant 0 : i32
    return %arg0, %c0_i32 : i32, i32
  }
  func.func @transform_3(%arg0: i32, %arg1: i32) -> (i32, i32) {
    %c0_i32 = arith.constant 0 : i32
    %c0_i32_0 = arith.constant 0 : i32
    %c0_i32_1 = arith.constant 0 : i32
    return %c0_i32, %c0_i32_0 : i32, i32
  }
  func.func @transform_4(%arg0: i32, %arg1: i32) -> (i32, i32) {
    %c0_i32 = arith.constant 0 : i32
    %c0_i32_0 = arith.constant 0 : i32
    %c0_i32_1 = arith.constant 0 : i32
    return %c0_i32, %c0_i32_0 : i32, i32
  }
  func.func @transform_5(%arg0: i32, %arg1: i32) -> (i32, i32) {
    %c0_i32 = arith.constant 0 : i32
    %c0_i32_0 = arith.constant 0 : i32
    %c0_i32_1 = arith.constant 0 : i32
    return %c0_i32, %c0_i32_0 : i32, i32
  }
  func.func @transform_6(%arg0: i32, %arg1: i32) -> (i32, i32, i32) {
    %c0_i32 = arith.constant 0 : i32
    %c0_i32_0 = arith.constant 0 : i32
    return %arg1, %arg0, %c0_i32 : i32, i32, i32
  }
}

</mosaic_0001>

<bundles_post_ra>
// kernel: tpu_custom_call.1
= control target key start
LH: loop header
LB: loop body
LE: loop exit
PB: predicated region body
PF: predicated region fallthrough
CT: control target
= control target key end

     0   :  { %11 = vsyncpa [#allocation3], 0  ;;  %s808_s0 = inlined_call_operand.vmem [shape: f32[2,8,128], index: 0, kind: input, shape index: {}]   ;;  %s809_s1 = inlined_call_operand.vmem [shape: s32[2,8,1], index: 1, kind: input, shape index: {}]   ;;  %s810_s2 = inlined_call_operand.vmem [shape: f32[8,128], index: 2, kind: input, shape index: {}]   ;;  %s811_s3 = inlined_call_operand.vmem [shape: f32[2,128], index: 3, kind: input, shape index: {}]   ;;  %s812_s4 = inlined_call_operand.vmem [shape: f32[1,128], index: 4, kind: input, shape index: {}]   ;;  %s813_s5 = inlined_call_operand.vmem [shape: f32[1,128], index: 5, kind: input, shape index: {}]   ;;  %s814_s6 = inlined_call_operand.hbm [shape: f32[2,8,128], index: 6, kind: output, shape index: {}]  }
   0x1   :  { %13 = vsyncpa [#allocation3 + $0x1], 0  ;;  %s681_s21 = smov 0   ;;  %s683_s22 = smov 0  }
   0x2   :  { %s685_s23 = smov 0   ;;  %s687_s24 = smov 0  }
   0x3   :  { %s689_s25 = smov 0   ;;  %s691_s26 = smov 0  }
   0x4 LB: > { %s490_s27 = sadd.s32 4294967295, %s642_s26   ;;  %s491_s28 = sadd.s32 4294967294, %s642_s26   ;;  %s642_s26 = sphi %s691_s26, %s19_s26   ;;  %s638_s25 = sphi %s689_s25, %s821_s25   ;;  %s634_s24 = sphi %s687_s24, %s820_s24   ;;  %s630_s23 = sphi %s685_s23, %s819_s23   ;;  %s626_s22 = sphi %s683_s22, %s818_s22   ;;  %s622_s21 = sphi %s681_s21, %s817_s21  }
   0x5   : > { %s28_s29 = sadd.s32 1, %s638_s25  ;;  %s185_s30 = sadd.s32 1, %s630_s23 }
   0x6   : > { %p29_p0 = scmp.ge.s32.totalorder %s28_s29, 2  ;;  %p195_p1 = scmp.ne.s32.totalorder %s630_s23, %s626_s22 }
   0x7   : > { %p196_p2 = scmp.eq.s32.totalorder %s490_s27, 1  ;;  %p201_p3 = scmp.ne.s32.totalorder %s626_s22, %s622_s21 }
   0x8   : > { %s823_s29 = smov (%p29_p0, %s28_s29), 0  ;;  %p202_p5 = scmp.eq.s32.totalorder %s491_s28, 1 }
   0x9   : > { %p721_p4 = por %p196_p2, %p195_p1  ;;  %s180_s8 = ssub.s32 %s638_s25, %s823_s29 }
   0xa   : > { %p495_p6 = scmp.ge.s32.totalorder %s642_s26, 1  ;;  %p183_p7 = scmp.eq.s32.totalorder %s180_s8, 0 }
   0xb   : > { %p728_p8 = por %p202_p5, %p201_p3  ;;  %p256_p9 = scmp.lt.s32.totalorder %s642_s26, 3 }
   0xc   : > { %s734_s10 = scalar_select %p183_p7, %s630_s23, %s185_s30  }
   0xd   : > { %p257_p10 = pnand %p495_p6, %p256_p9 }
   0xe   : > { %p299_p11 = scmp.lt.s32.totalorder (!%p257_p10), %s634_s24, 1  ;;  %v644_v0 = vmov (!%p257_p10), 0   ;;  %v328_v4 = vlaneseq (!%p257_p10)  ;;  %v321_v7 = vld [vmem:[%s811_s3] sm:$0x3] (!%p257_p10)  ;;  %s296_s30 = sand.u32 (!%p257_p10), 1, %s626_s22  }
   0xf   : > { %260 = sbr.rel (%p257_p10) target bundleno = 490 (0x1ea), region = 44  ;;  %561 = vset.pattern.permute.xlu0 (!%p257_p10), %v644_v0  ;;  %v318_v11 = vld [vmem:[%s810_s2] sm:$0xff] (!%p257_p10)  ;;  %s496_s8 = sshll.u32 (!%p257_p10), %s296_s30, 3 }
  0x10   : > { %v329_v5 = vshrl.u32 (!%p257_p10), %v328_v4, 7  ;;  %v499_v27 = vld [vmem:[%s812_s4] ss:$0 sm:$0xff] (!%p257_p10)  ;;  %s298_s16 = scalar_lea.vmem (!%p257_p10), [#allocation2], %s496_s8  ;;  %s375_s27 = scalar_lea.sflag (!%p257_p10), [#allocation3], %s296_s30 }
  0x11   : > { %v500_v29 = vld [vmem:[%s813_s5] ss:$0 sm:$0xff] (!%p257_p10)  ;;  %s389_s17 = sshll.u32 (!%p257_p10), %s298_s16, 4  ;;  %s763_s17 = int_to_ptr.vmem [resolvable:$true] %s389_s17 }
  0x12   : > { %v330_v6 = vsub.s32 (!%p257_p10), 0, %v329_v5  ;;  %v341_v8 = vsub.s32 (!%p257_p10), 1, %v329_v5  ;;  %s564_s28 = scalar_lea.vmem (!%p257_p10), %s763_s17, 128 }
  0x13   : > { %p565_p12 = scmp.ne.s32.totalorder (!%p257_p10), %s763_s17, %s564_s28 }
  0x14   : > { %v331_v12 = vrot.slane (!%p257_p10), %v321_v7, %v330_v6  ;;  %v342_v13 = vrot.slane (!%p257_p10), %v321_v7, %v341_v8 }
  0x15   : > { %p566_p13 = pnand (!%p257_p10), %p565_p12, %p721_p4 }
  0x16   : > { %s300_s11 = scalar_select %p299_p11, %s634_s24, 1 }
  0x17   : > { %p567_p0 = pneg %p566_p13 }
  0x18   : > { %s497_s12 = sshll.u32 %s300_s11, 3 }
  0x19   : > { %s312_s15 = scalar_lea.vmem %s809_s1, %s497_s12  ;;  %s305_s18 = scalar_lea.vmem %s808_s0, %s497_s12 }
  0x1a   : > { %v320_v1 = vld [vmem:[%s312_s15] sm:$0xff]  ;;  %s502_s15 = sshll.u32 %s634_s24, 7  ;;  %s645_s24 = smov [#allocation2]  }
  0x1b   : > { %vm322_vm0 = vcmp.eq.s32.totalorder %v320_v1, 0  ;;  %vm333_vm1 = vcmp.eq.s32.totalorder %v320_v1, 1  ;;  %v317_v10 = vld [vmem:[%s305_s18] sm:$0xff]  ;;  %s761_s20 = scalar_lea.hbm %s814_s6, %s502_s15  ;;  %s568_s8 = sshll.u32 %s645_s24, 4  ;;  %s569_s8 = int_to_ptr.vmem [resolvable:$false] %s568_s8 }
  0x1c   : > { %v323_v2 = vsel %vm322_vm0, 1, %v644_v0  ;;  %v334_v3 = vsel %vm333_vm1, 1, %v644_v0  ;;  %v319_v14 = vadd.f32 %v318_v11, %v317_v10  ;;  %s570_s11 = scalar_lea.vmem %s569_s8, 256  ;;  %p571_p1 = scmp.lt.s32.totalorder %s763_s17, %s569_s8 }
  0x1d   : > { %325 = vperm.xlu0 %561, %v323_v2   ;;  %p572_p2 = scmp.lt.s32.totalorder %s570_s11, %s564_s28 }
  0x1f   : > { %p573_p3 = por %p572_p2, %p571_p1 }
  0x21   : > { %336 = vperm.xlu0 %561, %v334_v3   ;;  %p574_p5 = pnand %p573_p3, %p567_p0 }
  0x9c   : > { %v326_v9 = vpop.permute.xlu0 %325 }
  0x9d   : > { %vm327_vm2 = vcmp.eq.s32.totalorder %v326_v9, 1 }
  0x9e   : > { %v332_v16 = vsel %vm327_vm2, %v331_v12, 0.0 }
  0xa0   : > { %v337_v15 = vpop.permute.xlu0 %336 }
  0xa1   : > { %vm338_vm3 = vcmp.eq.s32.totalorder %v337_v15, 1 }
  0xa2   : > { %v343_v17 = vsel %vm338_vm3, %v342_v13, %v332_v16 }
  0xa3   : > { %v344_v18 = vadd.f32 %v343_v17, %v319_v14 }
  0xa5   : > { %345 = vadd.xlane.f32.xlu1 %v344_v18 }
 0x132   : > { %v346_v19 = vpop.xlane.xlu1 %345 }
 0x133   : > { %v348_v20 = vmul.f32 0.0078125, %v346_v19 }
 0x135   : > { %v349_v21 = vsub.f32 %v344_v18, %v348_v20 }
 0x137   : > { %v350_v22 = vmul.f32 %v349_v21, %v349_v21 }
 0x139   : > { %351 = vadd.xlane.f32.xlu1 %v350_v22 }
 0x1c6   : > { %v352_v23 = vpop.xlane.xlu1 %351 }
 0x1c7   : > { %v353_v24 = vmul.f32 0.0078125, %v352_v23 }
 0x1c9   : > { %v354_v25 = vadd.f32 1e-12, %v353_v24 }
 0x1cb   : > { %562 = vrsqrt.f32 %v354_v25 }
 0x1d5   : > { %v563_v26 = vpop.eup %562 }
 0x1d6   : > { %v356_v28 = vmul.f32 %v563_v26, %v349_v21 }
 0x1d8   : > { %v364_v30 = vmul.f32 %v499_v27, %v356_v28 }
 0x1da   : > { %v372_v31 = vadd.f32 %v500_v29, %v364_v30 }
 0x1dc   : > { %373 = vst [vmem:[%s298_s16] sm:$0xff] %v372_v31 }
 0x1dd   : > { %577 = shalt.err (!%p574_p5)
}
 0x1de   : > { %s578_s30 = scalar_lea.hbm %s761_s20, 128  ;;  %s582_s14 = scalar_lea.hbm %s814_s6, 256 }
 0x1df   : > { %p579_p6 = scmp.ne.s32.totalorder %s761_s20, %s578_s30  ;;  %p583_p10 = scmp.lt.u32.totalorder %s761_s20, %s814_s6 }
 0x1e0   : > { %p584_p11 = scmp.lt.u32.totalorder %s582_s14, %s578_s30  ;;  %p586_p13 = scmp.lt.u32.totalorder %s578_s30, %s761_s20 }
 0x1e1   : > { %p580_p7 = pnand %p579_p6, %p721_p4 }
 0x1e2   : > { %p585_p12 = por %p584_p11, %p583_p10 }
 0x1e3   : > { %p581_p9 = pneg %p580_p7 }
 0x1e4   : > { %p587_p0 = por %p586_p13, %p585_p12 }
 0x1e6   : > { %p588_p1 = pnand %p587_p0, %p581_p9 }
 0x1e8   : > { %591 = shalt.err (!%p588_p1)
}
 0x1e9   : > { %505 = dma.vmem_to_hbm [thread:$0]  (%p721_p4), %s763_s17, 128, %s761_s20, %s375_s27  }
 0x1ea PF: > { %p511_p2 = scmp.ge.s32.totalorder %s642_s26, 2  ;;  %s401_s18 = sand.u32 1, %s622_s21  }
 0x1eb   : > { %s402_s19 = scalar_lea.sflag [#allocation3], %s401_s18 }
 0x1ec   : > { %p508_p3 = pnand %p511_p2, %p728_p8 }
 0x1ee   : > { %617 = dma.done.wait (!%p508_p3), %s402_s19, 128  }
 0x1ef   : > { %619 = vsyncadd (!%p508_p3), %s402_s19, 4294967168  ;;  %s19_s26 = sadd.s32 1, %s642_s26   ;;  %s817_s21 = smov %s626_s22 }
 0x1f0   : > { %p16_p5 = scmp.ge.s32.totalorder %s19_s26, 4   ;;  %s818_s22 = smov %s630_s23 }
 0x1f1   : > { %s819_s23 = smov %s734_s10  ;;  %s820_s24 = smov %s638_s25 }
 0x1f2   : > { %s821_s25 = smov %s823_s29  ;;  %18 = sbr.rel (!%p16_p5) target bundleno = 4 (0x4), region = 85 }
 0x1f9   :  { %407 = vsyncpa [#allocation3], 1 }
 0x1fa   :  { %409 = vsyncpa [#allocation3 + $0x1], 1 }

</bundles_post_ra>
